<compile_context>
chip_gen: v5e
topology: v5e:2x2
jax: 0.10.0
libtpu: 0.0.40
codegen_flags: <defaults>
</compile_context>

<pallas_src>
import functools

import jax
import jax.numpy as jnp
from jax import lax
from jax.experimental import pallas as pl
from jax.experimental.pallas import tpu as pltpu

# ----------------------------- config (small, synthetic) -----------------------------
VOCAB_SIZE = 64
EMBED_SIZE = 32          # C == hidden size H
N_BLOCKS = 2
BATCH = 2                # fixed by the workload; padded to 8 sublanes inside
SEQ_LEN = 8


# ----------------------------------- Pallas kernel -----------------------------------
def _rnn_kernel(ids_ref, emb_wxh_ref, bh_ref, whh_ref, whead_ref, bhead_ref,
                out_ref, xproj_ref, hist_ref, *, seq_len, b_pad):
    """Grid-less kernel; all operands resident in VMEM.

    ids_ref:     (T*Bp, 1)       int32 token ids, time-major, batch padded to Bp
    emb_wxh_ref: (V, NB*H)       E @ [Wxh_0 | ... | Wxh_{NB-1}]   (folded at init)
    bh_ref:      (1, NB*H)       per-block hidden biases, concatenated
    whh_ref:     (NB*H, NB*H)    block-diagonal recurrent weights
    whead_ref:   (NB*H, Vp)      lm_head, zero rows except last block, lane-padded
    bhead_ref:   (1, Vp)         lm_head bias, lane-padded
    out_ref:     (T*Bp, Vp)      logits (padded rows/cols are garbage/zero)
    xproj_ref:   (T*Bp, NB*H)    scratch: fused embedding + input projections
    hist_ref:    (T*Bp, NB*H)    scratch: full hidden state per timestep
    """
    n_rows, nbh = xproj_ref.shape
    vocab = emb_wxh_ref.shape[0]

    # ---- prologue: embedding gather + all input projections in ONE matmul ----
    #   x_t @ Wxh_b = (onehot @ E) @ Wxh_b = onehot @ (E @ Wxh_b)   (E@Wxh precomputed)
    ids = ids_ref[...]                                              # (T*Bp, 1)
    onehot = (ids == lax.broadcasted_iota(jnp.int32, (n_rows, vocab), 1)
              ).astype(jnp.float32)                                 # (T*Bp, V)
    xproj_ref[...] = (
        jnp.dot(onehot, emb_wxh_ref[...], preferred_element_type=jnp.float32)
        + bh_ref[...]
    )

    # ---- serial recurrence over time (static Python loop -> static aligned slices) ----
    whh = whh_ref[...]                                              # hoisted, read once
    h = jnp.zeros((b_pad, nbh), jnp.float32)   # reset_recurrent_blocks_hidden_states()
    for t in range(seq_len):
        row = t * b_pad
        pre = xproj_ref[row:row + b_pad, :] + jnp.dot(
            h, whh, preferred_element_type=jnp.float32)
        h = jnp.tanh(pre)
        hist_ref[row:row + b_pad, :] = h       # full-width unmasked aligned store

    # ---- epilogue: batched lm_head; zero rows in whead select the last block ----
    out_ref[...] = (
        jnp.dot(hist_ref[...], whead_ref[...], preferred_element_type=jnp.float32)
        + bhead_ref[...]
    )


# ------------------------------- one-time weight fusion -------------------------------
def prepare_fused_params(params):
    """Fuses per-block weights ONCE (off the per-call path)."""
    emb = params["embedding"].astype(jnp.float32)      # (V, C)
    wxh = params["wxh"].astype(jnp.float32)            # (NB, C, H)
    whh = params["whh"].astype(jnp.float32)            # (NB, H, H)
    bh = params["bh"].astype(jnp.float32)              # (NB, 1, H)
    whead = params["w_head"].astype(jnp.float32)       # (H, V)
    bhead = params["b_head"].astype(jnp.float32)       # (1, V)

    NB, C, H = wxh.shape
    V = whead.shape[1]
    V_pad = max(128, ((V + 127) // 128) * 128)         # lane-dense output width

    wxh_cat = jnp.transpose(wxh, (1, 0, 2)).reshape(C, NB * H)      # (C, NB*H)
    emb_wxh = emb @ wxh_cat                                          # (V, NB*H)
    bh_cat = bh.reshape(1, NB * H)                                   # (1, NB*H)

    whh_bd = jnp.zeros((NB * H, NB * H), jnp.float32)                # block-diagonal
    for b in range(NB):
        whh_bd = whh_bd.at[b * H:(b + 1) * H, b * H:(b + 1) * H].set(whh[b])

    # zero rows for blocks 0..NB-2 (only last block feeds lm_head), lane-padded cols
    whead_full = jnp.zeros((NB * H, V_pad), jnp.float32)
    whead_full = whead_full.at[(NB - 1) * H:NB * H, :V].set(whead)
    bhead_pad = jnp.zeros((1, V_pad), jnp.float32).at[:, :V].set(bhead)

    return {
        "emb_wxh": emb_wxh,
        "bh_cat": bh_cat,
        "whh_bd": whh_bd,
        "whead_full": whead_full,
        "bhead_pad": bhead_pad,
    }


# --------------------------------------- forward ---------------------------------------
def rnn_forward(idx, fused, targets=None):
    """idx: (B, T) int32 token ids.  Returns (logits (B, T, V), loss or None)."""
    B, T = idx.shape
    NBH = fused["whh_bd"].shape[0]
    V = fused["emb_wxh"].shape[0]          # vocab (square lm_head in this config)
    V_pad = fused["whead_full"].shape[1]
    B_pad = max(8, ((B + 7) // 8) * 8)     # pad batch to a full sublane tile

    # Tiny int glue only: time-major, batch-padded token ids (padded rows read
    # token 0; their rows are garbage and never read back).
    ids = jnp.pad(idx.T.astype(jnp.int32), ((0, 0), (0, B_pad - B)))
    ids = ids.reshape(T * B_pad, 1)

    kernel = functools.partial(_rnn_kernel, seq_len=T, b_pad=B_pad)
    vmem = lambda: pl.BlockSpec(memory_space=pltpu.MemorySpace.VMEM)

    logits_flat = pl.pallas_call(
        kernel,
        out_shape=jax.ShapeDtypeStruct((T * B_pad, V_pad), jnp.float32),
        in_specs=[vmem() for _ in range(6)],
        out_specs=vmem(),
        scratch_shapes=[
            pltpu.VMEM((T * B_pad, NBH), jnp.float32),   # fused input projections
            pltpu.VMEM((T * B_pad, NBH), jnp.float32),   # full hidden-state history
        ],
    )(ids, fused["emb_wxh"], fused["bh_cat"], fused["whh_bd"],
      fused["whead_full"], fused["bhead_pad"])

    logits = logits_flat.reshape(T, B_pad, V_pad)[:, :B, :V]   # drop pad rows/lanes
    logits = jnp.transpose(logits, (1, 0, 2))                  # (B, T, V)

    loss = None
    if targets is not None:
        flat_logits = logits.reshape(B * T, V)
        flat_targets = targets.reshape(B * T)
        logp = jax.nn.log_softmax(flat_logits, axis=-1)
        loss = -jnp.mean(jnp.take_along_axis(logp, flat_targets[:, None], axis=1))
    return logits, loss


# ------------------------------ deterministic parameters ------------------------------
def init_params(key):
    ks = jax.random.split(key, 6)
    scale = 0.02
    return {
        "embedding": scale * jax.random.normal(ks[0], (VOCAB_SIZE, EMBED_SIZE), jnp.float32),
        "wxh": scale * jax.random.normal(ks[1], (N_BLOCKS, EMBED_SIZE, EMBED_SIZE), jnp.float32),
        "whh": scale * jax.random.normal(ks[2], (N_BLOCKS, EMBED_SIZE, EMBED_SIZE), jnp.float32),
        "bh": jnp.zeros((N_BLOCKS, 1, EMBED_SIZE), jnp.float32),
        "w_head": scale * jax.random.normal(ks[3], (EMBED_SIZE, VOCAB_SIZE), jnp.float32),
        "b_head": jnp.zeros((1, VOCAB_SIZE), jnp.float32),
    }


if __name__ == "__main__":
    key = jax.random.PRNGKey(0)
    params = init_params(key)
    fused = prepare_fused_params(params)   # one-time weight fusion (off the call path)

    idx = jax.random.randint(jax.random.PRNGKey(1), (BATCH, SEQ_LEN), 0, VOCAB_SIZE, jnp.int32)
    targets = jax.random.randint(jax.random.PRNGKey(2), (BATCH, SEQ_LEN), 0, VOCAB_SIZE, jnp.int32)

    fwd = jax.jit(rnn_forward)
    logits, loss = fwd(idx, fused, targets)
    jax.block_until_ready(logits)
    jax.block_until_ready(loss)

    assert logits.shape == (BATCH, SEQ_LEN, VOCAB_SIZE)
    assert loss.shape == ()
    print("KERNEL_OK")
</pallas_src>

<mosaic_0001>
module attributes {stable_mosaic.version = 11 : i64} {
  func.func @_rnn_kernel(%arg0: memref<64x1xi32, #tpu.memory_space<vmem>>, %arg1: memref<64x64xf32, #tpu.memory_space<vmem>>, %arg2: memref<1x64xf32, #tpu.memory_space<vmem>>, %arg3: memref<64x64xf32, #tpu.memory_space<vmem>>, %arg4: memref<64x128xf32, #tpu.memory_space<vmem>>, %arg5: memref<1x128xf32, #tpu.memory_space<vmem>>, %arg6: memref<64x128xf32, #tpu.memory_space<vmem>>, %arg7: memref<64x64xf32, #tpu.memory_space<vmem>>, %arg8: memref<64x64xf32, #tpu.memory_space<vmem>>) attributes {dimension_semantics = [], scalar_prefetch = 0 : i64, scratch_operands = 2 : i64, tpu.core_type = #tpu.core_type<tc>} {
    %c0 = arith.constant 0 : index
    %c0_0 = arith.constant 0 : index
    %0 = vector.load %arg0[%c0, %c0_0] : memref<64x1xi32, #tpu.memory_space<vmem>>, vector<64x1xi32>
    %1 = tpu.iota {dimensions = array<i32: 1>} : vector<64x64xi32>
    %2 = vector.broadcast %0 : vector<64x1xi32> to vector<64x64xi32>
    %3 = arith.cmpi eq, %2, %1 : vector<64x64xi32>
    %4 = arith.extui %3 : vector<64x64xi1> to vector<64x64xi32>
    %5 = arith.sitofp %4 : vector<64x64xi32> to vector<64x64xf32>
    %c0_1 = arith.constant 0 : index
    %c0_2 = arith.constant 0 : index
    %6 = vector.load %arg1[%c0_1, %c0_2] : memref<64x64xf32, #tpu.memory_space<vmem>>, vector<64x64xf32>
    %cst = arith.constant dense<0.000000e+00> : vector<64x64xf32>
    %7 = tpu.matmul %5, %6, %cst {dimension_numbers = #tpu.dot_dimension_numbers<[1], [0], [0], [1], [0, 0, 1, 1], [], []>} : vector<64x64xf32>, vector<64x64xf32>, vector<64x64xf32> -> vector<64x64xf32>
    %c0_3 = arith.constant 0 : index
    %c0_4 = arith.constant 0 : index
    %8 = vector.load %arg2[%c0_3, %c0_4] : memref<1x64xf32, #tpu.memory_space<vmem>>, vector<1x64xf32>
    %9 = vector.broadcast %8 : vector<1x64xf32> to vector<64x64xf32>
    %10 = arith.addf %7, %9 : vector<64x64xf32>
    %c0_5 = arith.constant 0 : index
    %c0_6 = arith.constant 0 : index
    %11 = vector.load %arg7[%c0_5, %c0_6] : memref<64x64xf32, #tpu.memory_space<vmem>>, vector<64x64xf32>
    tpu.vector_store %arg7[%c0_5, %c0_6], %10 {strides = array<i32>} : memref<64x64xf32, #tpu.memory_space<vmem>>, vector<64x64xf32>,
    %c0_7 = arith.constant 0 : index
    %c0_8 = arith.constant 0 : index
    %12 = vector.load %arg3[%c0_7, %c0_8] : memref<64x64xf32, #tpu.memory_space<vmem>>, vector<64x64xf32>
    %cst_9 = arith.constant 0.000000e+00 : f32
    %13 = vector.broadcast %cst_9 : f32 to vector<8x64xf32>
    %c0_10 = arith.constant 0 : index
    %c0_11 = arith.constant 0 : index
    %14 = vector.load %arg7[%c0_10, %c0_11] : memref<64x64xf32, #tpu.memory_space<vmem>>, vector<8x64xf32>
    %cst_12 = arith.constant dense<0.000000e+00> : vector<8x64xf32>
    %15 = tpu.matmul %13, %12, %cst_12 {dimension_numbers = #tpu.dot_dimension_numbers<[1], [0], [0], [1], [0, 0, 1, 1], [], []>} : vector<8x64xf32>, vector<64x64xf32>, vector<8x64xf32> -> vector<8x64xf32>
    %16 = arith.addf %14, %15 : vector<8x64xf32>
    %17 = math.tanh %16 : vector<8x64xf32>
    %c0_13 = arith.constant 0 : index
    %c0_14 = arith.constant 0 : index
    %18 = vector.load %arg8[%c0_13, %c0_14] : memref<64x64xf32, #tpu.memory_space<vmem>>, vector<8x64xf32>
    tpu.vector_store %arg8[%c0_13, %c0_14], %17 {strides = array<i32>} : memref<64x64xf32, #tpu.memory_space<vmem>>, vector<8x64xf32>,
    %c8 = arith.constant 8 : index
    %c0_15 = arith.constant 0 : index
    %19 = vector.load %arg7[%c8, %c0_15] : memref<64x64xf32, #tpu.memory_space<vmem>>, vector<8x64xf32>
    %cst_16 = arith.constant dense<0.000000e+00> : vector<8x64xf32>
    %20 = tpu.matmul %17, %12, %cst_16 {dimension_numbers = #tpu.dot_dimension_numbers<[1], [0], [0], [1], [0, 0, 1, 1], [], []>} : vector<8x64xf32>, vector<64x64xf32>, vector<8x64xf32> -> vector<8x64xf32>
    %21 = arith.addf %19, %20 : vector<8x64xf32>
    %22 = math.tanh %21 : vector<8x64xf32>
    %c8_17 = arith.constant 8 : index
    %c0_18 = arith.constant 0 : index
    %23 = vector.load %arg8[%c8_17, %c0_18] : memref<64x64xf32, #tpu.memory_space<vmem>>, vector<8x64xf32>
    tpu.vector_store %arg8[%c8_17, %c0_18], %22 {strides = array<i32>} : memref<64x64xf32, #tpu.memory_space<vmem>>, vector<8x64xf32>,
    %c16 = arith.constant 16 : index
    %c0_19 = arith.constant 0 : index
    %24 = vector.load %arg7[%c16, %c0_19] : memref<64x64xf32, #tpu.memory_space<vmem>>, vector<8x64xf32>
    %cst_20 = arith.constant dense<0.000000e+00> : vector<8x64xf32>
    %25 = tpu.matmul %22, %12, %cst_20 {dimension_numbers = #tpu.dot_dimension_numbers<[1], [0], [0], [1], [0, 0, 1, 1], [], []>} : vector<8x64xf32>, vector<64x64xf32>, vector<8x64xf32> -> vector<8x64xf32>
    %26 = arith.addf %24, %25 : vector<8x64xf32>
    %27 = math.tanh %26 : vector<8x64xf32>
    %c16_21 = arith.constant 16 : index
    %c0_22 = arith.constant 0 : index
    %28 = vector.load %arg8[%c16_21, %c0_22] : memref<64x64xf32, #tpu.memory_space<vmem>>, vector<8x64xf32>
    tpu.vector_store %arg8[%c16_21, %c0_22], %27 {strides = array<i32>} : memref<64x64xf32, #tpu.memory_space<vmem>>, vector<8x64xf32>,
    %c24 = arith.constant 24 : index
    %c0_23 = arith.constant 0 : index
    %29 = vector.load %arg7[%c24, %c0_23] : memref<64x64xf32, #tpu.memory_space<vmem>>, vector<8x64xf32>
    %cst_24 = arith.constant dense<0.000000e+00> : vector<8x64xf32>
    %30 = tpu.matmul %27, %12, %cst_24 {dimension_numbers = #tpu.dot_dimension_numbers<[1], [0], [0], [1], [0, 0, 1, 1], [], []>} : vector<8x64xf32>, vector<64x64xf32>, vector<8x64xf32> -> vector<8x64xf32>
    %31 = arith.addf %29, %30 : vector<8x64xf32>
    %32 = math.tanh %31 : vector<8x64xf32>
    %c24_25 = arith.constant 24 : index
    %c0_26 = arith.constant 0 : index
    %33 = vector.load %arg8[%c24_25, %c0_26] : memref<64x64xf32, #tpu.memory_space<vmem>>, vector<8x64xf32>
    tpu.vector_store %arg8[%c24_25, %c0_26], %32 {strides = array<i32>} : memref<64x64xf32, #tpu.memory_space<vmem>>, vector<8x64xf32>,
    %c32 = arith.constant 32 : index
    %c0_27 = arith.constant 0 : index
    %34 = vector.load %arg7[%c32, %c0_27] : memref<64x64xf32, #tpu.memory_space<vmem>>, vector<8x64xf32>
    %cst_28 = arith.constant dense<0.000000e+00> : vector<8x64xf32>
    %35 = tpu.matmul %32, %12, %cst_28 {dimension_numbers = #tpu.dot_dimension_numbers<[1], [0], [0], [1], [0, 0, 1, 1], [], []>} : vector<8x64xf32>, vector<64x64xf32>, vector<8x64xf32> -> vector<8x64xf32>
    %36 = arith.addf %34, %35 : vector<8x64xf32>
    %37 = math.tanh %36 : vector<8x64xf32>
    %c32_29 = arith.constant 32 : index
    %c0_30 = arith.constant 0 : index
    %38 = vector.load %arg8[%c32_29, %c0_30] : memref<64x64xf32, #tpu.memory_space<vmem>>, vector<8x64xf32>
    tpu.vector_store %arg8[%c32_29, %c0_30], %37 {strides = array<i32>} : memref<64x64xf32, #tpu.memory_space<vmem>>, vector<8x64xf32>,
    %c40 = arith.constant 40 : index
    %c0_31 = arith.constant 0 : index
    %39 = vector.load %arg7[%c40, %c0_31] : memref<64x64xf32, #tpu.memory_space<vmem>>, vector<8x64xf32>
    %cst_32 = arith.constant dense<0.000000e+00> : vector<8x64xf32>
    %40 = tpu.matmul %37, %12, %cst_32 {dimension_numbers = #tpu.dot_dimension_numbers<[1], [0], [0], [1], [0, 0, 1, 1], [], []>} : vector<8x64xf32>, vector<64x64xf32>, vector<8x64xf32> -> vector<8x64xf32>
    %41 = arith.addf %39, %40 : vector<8x64xf32>
    %42 = math.tanh %41 : vector<8x64xf32>
    %c40_33 = arith.constant 40 : index
    %c0_34 = arith.constant 0 : index
    %43 = vector.load %arg8[%c40_33, %c0_34] : memref<64x64xf32, #tpu.memory_space<vmem>>, vector<8x64xf32>
    tpu.vector_store %arg8[%c40_33, %c0_34], %42 {strides = array<i32>} : memref<64x64xf32, #tpu.memory_space<vmem>>, vector<8x64xf32>,
    %c48 = arith.constant 48 : index
    %c0_35 = arith.constant 0 : index
    %44 = vector.load %arg7[%c48, %c0_35] : memref<64x64xf32, #tpu.memory_space<vmem>>, vector<8x64xf32>
    %cst_36 = arith.constant dense<0.000000e+00> : vector<8x64xf32>
    %45 = tpu.matmul %42, %12, %cst_36 {dimension_numbers = #tpu.dot_dimension_numbers<[1], [0], [0], [1], [0, 0, 1, 1], [], []>} : vector<8x64xf32>, vector<64x64xf32>, vector<8x64xf32> -> vector<8x64xf32>
    %46 = arith.addf %44, %45 : vector<8x64xf32>
    %47 = math.tanh %46 : vector<8x64xf32>
    %c48_37 = arith.constant 48 : index
    %c0_38 = arith.constant 0 : index
    %48 = vector.load %arg8[%c48_37, %c0_38] : memref<64x64xf32, #tpu.memory_space<vmem>>, vector<8x64xf32>
    tpu.vector_store %arg8[%c48_37, %c0_38], %47 {strides = array<i32>} : memref<64x64xf32, #tpu.memory_space<vmem>>, vector<8x64xf32>,
    %c56 = arith.constant 56 : index
    %c0_39 = arith.constant 0 : index
    %49 = vector.load %arg7[%c56, %c0_39] : memref<64x64xf32, #tpu.memory_space<vmem>>, vector<8x64xf32>
    %cst_40 = arith.constant dense<0.000000e+00> : vector<8x64xf32>
    %50 = tpu.matmul %47, %12, %cst_40 {dimension_numbers = #tpu.dot_dimension_numbers<[1], [0], [0], [1], [0, 0, 1, 1], [], []>} : vector<8x64xf32>, vector<64x64xf32>, vector<8x64xf32> -> vector<8x64xf32>
    %51 = arith.addf %49, %50 : vector<8x64xf32>
    %52 = math.tanh %51 : vector<8x64xf32>
    %c56_41 = arith.constant 56 : index
    %c0_42 = arith.constant 0 : index
    %53 = vector.load %arg8[%c56_41, %c0_42] : memref<64x64xf32, #tpu.memory_space<vmem>>, vector<8x64xf32>
    tpu.vector_store %arg8[%c56_41, %c0_42], %52 {strides = array<i32>} : memref<64x64xf32, #tpu.memory_space<vmem>>, vector<8x64xf32>,
    %c0_43 = arith.constant 0 : index
    %c0_44 = arith.constant 0 : index
    %54 = vector.load %arg8[%c0_43, %c0_44] : memref<64x64xf32, #tpu.memory_space<vmem>>, vector<64x64xf32>
    %c0_45 = arith.constant 0 : index
    %c0_46 = arith.constant 0 : index
    %55 = vector.load %arg4[%c0_45, %c0_46] : memref<64x128xf32, #tpu.memory_space<vmem>>, vector<64x128xf32>
    %cst_47 = arith.constant dense<0.000000e+00> : vector<64x128xf32>
    %56 = tpu.matmul %54, %55, %cst_47 {dimension_numbers = #tpu.dot_dimension_numbers<[1], [0], [0], [1], [0, 0, 1, 1], [], []>} : vector<64x64xf32>, vector<64x128xf32>, vector<64x128xf32> -> vector<64x128xf32>
    %c0_48 = arith.constant 0 : index
    %c0_49 = arith.constant 0 : index
    %57 = vector.load %arg5[%c0_48, %c0_49] : memref<1x128xf32, #tpu.memory_space<vmem>>, vector<1x128xf32>
    %58 = vector.broadcast %57 : vector<1x128xf32> to vector<64x128xf32>
    %59 = arith.addf %56, %58 : vector<64x128xf32>
    %c0_50 = arith.constant 0 : index
    %c0_51 = arith.constant 0 : index
    %60 = vector.load %arg6[%c0_50, %c0_51] : memref<64x128xf32, #tpu.memory_space<vmem>>, vector<64x128xf32>
    tpu.vector_store %arg6[%c0_50, %c0_51], %59 {strides = array<i32>} : memref<64x128xf32, #tpu.memory_space<vmem>>, vector<64x128xf32>,
    return
  }
}

</mosaic_0001>

<bundles_post_ra>
// kernel: rnn_forward.1
= control target key start
LH: loop header
LB: loop body
LE: loop exit
PB: predicated region body
PF: predicated region fallthrough
CT: control target
= control target key end

     0   :  { %11 = vsyncpa [#allocation5], 0  ;;  %s915_s0 = inlined_call_operand.vmem [shape: s32[64,1], index: 0, kind: input, shape index: {}]   ;;  %s916_s1 = inlined_call_operand.vmem [shape: f32[64,64], index: 1, kind: input, shape index: {}]   ;;  %s917_s2 = inlined_call_operand.vmem [shape: f32[1,64], index: 2, kind: input, shape index: {}]   ;;  %s918_s3 = inlined_call_operand.hbm [shape: f32[64,64], index: 3, kind: input, shape index: {}]   ;;  %s919_s4 = inlined_call_operand.hbm [shape: f32[64,128], index: 4, kind: input, shape index: {}]   ;;  %s920_s5 = inlined_call_operand.vmem [shape: f32[1,128], index: 5, kind: input, shape index: {}]   ;;  %s921_s6 = inlined_call_operand.vmem [shape: f32[64,128], index: 6, kind: output, shape index: {}]  }
   0x1   :  { %s23_s23 = sshll.u32 %s918_s3, 4  ;;  %s24_s23 = int_to_ptr.hbm [resolvable:$true] %s23_s23 }
   0x2   :  { %12 = vsyncpa [#allocation7], 0  ;;  %s632_s24 = smov [#allocation4]   ;;  %s36_s28 = sshll.u32 %s919_s4, 4  ;;  %s37_s28 = int_to_ptr.hbm [resolvable:$true] %s36_s28 }
   0x3   :  { %s25_s25 = sshll.u32 %s632_s24, 4  ;;  %s633_s29 = smov 128   ;;  %s26_s25 = int_to_ptr.vmem [resolvable:$true] %s25_s25 }
   0x4   :  { %s634_s30 = smov 8   ;;  %s635_s7 = smov [#allocation6]  }
   0x5   :  { %31 = dma.hbm_to_vmem [thread:$0]  %s24_s23, 1024, %s26_s25, [#allocation5], %s633_s29, %s633_s29, %s634_s30  }
   0x6   :  { %s38_s8 = sshll.u32 %s635_s7, 4  ;;  %s39_s8 = int_to_ptr.vmem [resolvable:$true] %s38_s8 }
   0x7   :  { %44 = dma.hbm_to_vmem [thread:$0]  %s37_s28, 1024, %s39_s8, [#allocation7], %s633_s29, %s633_s29, %s634_s30  }
   0x8   :  { %628 = dma.done.wait [#allocation5], 1024  }
   0x9   :  { %629 = vsyncadd [#allocation5], 4294966272 }
   0xa   :  { %630 = dma.done.wait [#allocation7], 1024  }
   0xb   :  { %631 = vsyncadd [#allocation7], 4294966272  ;;  %v636_v0 = vmov 0   ;;  %v55_v1 = vld [vmem:[%s915_s0] sm:$0xff]  ;;  %v57_v2 = vld [vmem:[%s915_s0 + $0x10] sm:$0xff]  ;;  %v637_v24 = vmov 0.0   ;;  %v63_v25 = vlaneseq }
   0xc   :  { %559 = vset.pattern.permute.xlu0 %v636_v0  ;;  %560 = vset.pattern.permute.xlu1 %v636_v0  ;;  %v59_v3 = vld [vmem:[%s915_s0 + $0x20] sm:$0xff]  ;;  %v120_v4 = vld [vmem:[%s916_s1 + $0x38] sm:$0xff]  ;;  %v119_v5 = vld [vmem:[%s916_s1 + $0x30] sm:$0xff]  ;;  %vm125_vm0 = vcmask 523264  }
   0xd   :  { %561 = vset.pattern.permute.xlu2 %v636_v0  ;;  %66 = vperm.xlu0 %559, %v55_v1   ;;  %v118_v6 = vld [vmem:[%s916_s1 + $0x28] sm:$0xff]  ;;  %v697_v7 = vld [vmem:[#allocation4 + $0x38] sm:$0xff]  ;;  %v700_v8 = vld [vmem:[#allocation4 + $0x30] sm:$0xff]  ;;  %v773_v26 = vand.u32 127, %v63_v25 }
   0xe   :  { %72 = vperm.xlu1 %560, %v57_v2   ;;  %78 = vperm.xlu2 %561, %v59_v3   ;;  %v56_v9 = vld [vmem:[%s915_s0 + $0x8] sm:$0xff]  ;;  %v58_v10 = vld [vmem:[%s915_s0 + $0x18] sm:$0xff]  ;;  %v117_v12 = vld [vmem:[%s916_s1 + $0x20] sm:$0xff] }
   0xf   :  { %158 = vmatpush.msra.mxu0 %v120_v4  ;;  %219 = vmatpush.msra.mxu1 %v697_v7  ;;  %v60_v11 = vld [vmem:[%s915_s0 + $0x28] sm:$0xff]  ;;  %v116_v13 = vld [vmem:[%s916_s1 + $0x18] sm:$0xff]  ;;  %v115_v14 = vld [vmem:[%s916_s1 + $0x10] sm:$0xff] }
  0x10   :  { %246 = vmatpush.msra.mxu2 %v697_v7  ;;  %v114_v15 = vld [vmem:[%s916_s1 + $0x8] sm:$0xff]  ;;  %v61_v16 = vld [vmem:[%s915_s0 + $0x30] sm:$0xff]  ;;  %v113_v17 = vld [vmem:[%s916_s1] sm:$0xff] }
  0x11   :  { %159 = vmatpush.msra.mxu0 %v119_v5  ;;  %220 = vmatpush.msra.mxu1 %v700_v8  ;;  %v732_v18 = vld [vmem:[#allocation4 + $0x28] sm:$0xff]  ;;  %v735_v19 = vld [vmem:[#allocation4 + $0x20] sm:$0xff]  ;;  %v737_v20 = vld [vmem:[#allocation4 + $0x18] sm:$0xff] }
  0x12   :  { %247 = vmatpush.msra.mxu2 %v700_v8  ;;  %v741_v21 = vld [vmem:[#allocation4 + $0x10] sm:$0xff]  ;;  %v747_v22 = vld [vmem:[#allocation4 + $0x8] sm:$0xff]  ;;  %v751_v23 = vld [vmem:[#allocation4] sm:$0xff] }
  0x13   :  { %160 = vmatpush.msra.mxu0 %v118_v6  ;;  %221 = vmatpush.msra.mxu1 %v732_v18  ;;  %v438_v41 = vld [vmem:[#allocation6 + $0x38] sm:$0xff]  ;;  %v437_v42 = vld [vmem:[#allocation6 + $0x30] sm:$0xff]  ;;  %v436_v43 = vld [vmem:[#allocation6 + $0x28] sm:$0xff] }
  0x14   :  { %248 = vmatpush.msra.mxu2 %v732_v18  ;;  %475 = vmatpush.msra.mxu3 %v438_v41  ;;  %v435_v44 = vld [vmem:[#allocation6 + $0x20] sm:$0xff]  ;;  %v434_v45 = vld [vmem:[#allocation6 + $0x18] sm:$0xff]  ;;  %v433_v46 = vld [vmem:[#allocation6 + $0x10] sm:$0xff] }
  0x15   :  { %69 = vperm.xlu0 %559, %v56_v9   ;;  %161 = vmatpush.msra.mxu0 %v117_v12  ;;  %v432_v47 = vld [vmem:[#allocation6 + $0x8] sm:$0xff]  ;;  %v431_v48 = vld [vmem:[#allocation6] sm:$0xff]  ;;  %v62_v52 = vld [vmem:[%s915_s0 + $0x38] sm:$0xff] }
  0x16   :  { %75 = vperm.xlu1 %560, %v58_v10   ;;  %81 = vperm.xlu2 %561, %v60_v11   ;;  %v807_v49 = vld [vmem:[%s917_s2] ss:$0 sm:$0xff] }
  0x17   :  { %162 = vmatpush.msra.mxu0 %v116_v13  ;;  %222 = vmatpush.msra.mxu1 %v735_v19  ;;  %v843_v13 = vld [vmem:[%s920_s5] ss:$0 sm:$0xff] }
  0x18   :  { %249 = vmatpush.msra.mxu2 %v735_v19  ;;  %476 = vmatpush.msra.mxu3 %v437_v42 }
  0x19   :  { %163 = vmatpush.msra.mxu0 %v115_v14  ;;  %223 = vmatpush.msra.mxu1 %v737_v20 }
  0x1a   :  { %250 = vmatpush.msra.mxu2 %v737_v20  ;;  %477 = vmatpush.msra.mxu3 %v436_v43 }
  0x1b   :  { %164 = vmatpush.msra.mxu0 %v114_v15  ;;  %224 = vmatpush.msra.mxu1 %v741_v21 }
  0x1c   :  { %251 = vmatpush.msra.mxu2 %v741_v21  ;;  %478 = vmatpush.msra.mxu3 %v435_v44 }
  0x1d   :  { %84 = vperm.xlu0 %559, %v61_v16   ;;  %165 = vmatpush.msra.mxu0 %v113_v17 }
  0x1e   :  { %225 = vmatpush.msra.mxu1 %v747_v22  ;;  %252 = vmatpush.msra.mxu2 %v747_v22 }
  0x1f   :  { %479 = vmatpush.msra.mxu3 %v434_v45  ;;  %87 = vperm.xlu1 %560, %v62_v52  }
  0x20   :  { %226 = vmatpush.msra.mxu1 %v751_v23  ;;  %253 = vmatpush.msra.mxu2 %v751_v23 }
  0x21   :  { %227 = vmatmul.f32.vlgmr.msra.gmra.mxu1 %v637_v24  ;;  %480 = vmatpush.msra.mxu3 %v433_v46 }
  0x22   :  { %273 = vmatpush.msrb.mxu1 %v697_v7  ;;  %327 = vmatpush.msrb.mxu2 %v697_v7 }
  0x23   :  { %481 = vmatpush.msra.mxu3 %v432_v47 }
  0x24   :  { %274 = vmatpush.msrb.mxu1 %v700_v8  ;;  %328 = vmatpush.msrb.mxu2 %v700_v8 }
  0x25   :  { %482 = vmatpush.msra.mxu3 %v431_v48 }
  0x26   :  { %275 = vmatpush.msrb.mxu1 %v732_v18  ;;  %329 = vmatpush.msrb.mxu2 %v732_v18 }
  0x28   :  { %276 = vmatpush.msrb.mxu1 %v735_v19  ;;  %330 = vmatpush.msrb.mxu2 %v735_v19 }
  0x2a   :  { %277 = vmatpush.msrb.mxu1 %v737_v20  ;;  %331 = vmatpush.msrb.mxu2 %v737_v20 }
  0x2c   :  { %278 = vmatpush.msrb.mxu1 %v741_v21  ;;  %332 = vmatpush.msrb.mxu2 %v741_v21 }
  0x2e   :  { %279 = vmatpush.msrb.mxu1 %v747_v22  ;;  %333 = vmatpush.msrb.mxu2 %v747_v22 }
  0x30   :  { %280 = vmatpush.msrb.mxu1 %v751_v23  ;;  %334 = vmatpush.msrb.mxu2 %v751_v23 }
  0x32   :  { %300 = vmatpush.msra.mxu1 %v697_v7 }
  0x34   :  { %301 = vmatpush.msra.mxu1 %v700_v8 }
  0x36   :  { %302 = vmatpush.msra.mxu1 %v732_v18 }
  0x38   :  { %303 = vmatpush.msra.mxu1 %v735_v19 }
  0x3a   :  { %304 = vmatpush.msra.mxu1 %v737_v20 }
  0x3c   :  { %305 = vmatpush.msra.mxu1 %v741_v21 }
  0x3e   :  { %306 = vmatpush.msra.mxu1 %v747_v22 }
  0x40   :  { %307 = vmatpush.msra.mxu1 %v751_v23 }
  0x68   :  { %v79_v35 = vpop.permute.xlu2 %78 }
  0x69   :  { %vm93_vm5 = vcmp.eq.s32.totalorder %v79_v35, %v773_v26 }
  0x6a   :  { %v526_v36 = vsel %vm93_vm5, 1.0, %v637_v24 }
  0x70   :  { %v82_v37 = vpop.permute.xlu2 %81 }
  0x71   :  { %vm94_vm6 = vcmp.eq.s32.totalorder %v82_v37, %v773_v26 }
  0x72   :  { %v527_v38 = vsel %vm94_vm6, 1.0, %v637_v24 }
  0x7f   :  { %v67_v27 = vpop.permute.xlu0 %66 }
  0x80   :  { %vm89_vm1 = vcmp.eq.s32.totalorder %v67_v27, %v773_v26  ;;  %v73_v30 = vpop.permute.xlu1 %72 }
  0x81   :  { %v522_v28 = vsel %vm89_vm1, 1.0, %v637_v24  ;;  %vm91_vm3 = vcmp.eq.s32.totalorder %v73_v30, %v773_v26 }
  0x82   :  { %530 = vmatmul.msk.f32.vlgmr.msra.gmra.mxu0 %vm125_vm0, %v522_v28  ;;  %v524_v32 = vsel %vm91_vm3, 1.0, %v637_v24 }
  0x87   :  { %v70_v29 = vpop.permute.xlu0 %69 }
  0x88   :  { %vm90_vm2 = vcmp.eq.s32.totalorder %v70_v29, %v773_v26  ;;  %v76_v33 = vpop.permute.xlu1 %75 }
  0x89   :  { %v523_v31 = vsel %vm90_vm2, 1.0, %v637_v24  ;;  %vm92_vm4 = vcmp.eq.s32.totalorder %v76_v33, %v773_v26 }
  0x8a   :  { %531 = vmatmul.msk.f32.gmra.mxu0 %vm125_vm0, %v523_v31  ;;  %v525_v34 = vsel %vm92_vm4, 1.0, %v637_v24 }
  0x8f   :  { %v85_v39 = vpop.permute.xlu0 %84 }
  0x90   :  { %vm95_vm7 = vcmp.eq.s32.totalorder %v85_v39, %v773_v26 }
  0x91   :  { %v528_v40 = vsel %vm95_vm7, 1.0, %v637_v24  ;;  %v88_v6 = vpop.permute.xlu1 %87 }
  0x92   :  { %532 = vmatmul.msk.f32.gmra.mxu0 %vm125_vm0, %v524_v32  ;;  %vm96_vm8 = vcmp.eq.s32.totalorder %v88_v6, %v773_v26 }
  0x93   :  { %v529_v9 = vsel %vm96_vm8, 1.0, %v637_v24 }
  0x9a   :  { %533 = vmatmul.msk.f32.gmra.mxu0 %vm125_vm0, %v525_v34 }
  0x9e   :  { %v228_v54 = vpop.f32.mrf.mxu1 }
  0xa2   :  { %534 = vmatmul.msk.f32.gmra.mxu0 %vm125_vm0, %v526_v36 }
  0xaa   :  { %535 = vmatmul.msk.f32.gmra.mxu0 %vm125_vm0, %v527_v38 }
  0xb2   :  { %536 = vmatmul.msk.f32.gmra.mxu0 %vm125_vm0, %v528_v40 }
  0xba   :  { %537 = vmatmul.msk.f32.gmra.mxu0 %vm125_vm0, %v529_v9 }
  0xff   :  { %v167_v50 = vpop.f32.mrf.mxu0 }
 0x100   :  { %v168_v51 = vadd.f32 %v807_v49, %v167_v50 }
 0x102   :  { %191 = vst.msk [vmem:[#allocation2] sm:$0xff] %vm125_vm0, %v168_v51 }
 0x107   :  { %v170_v53 = vpop.f32.mrf.mxu0 }
 0x108   :  { %v171_v55 = vadd.f32 %v807_v49, %v170_v53 }
 0x109   :  { %v207_v56 = vld [vmem:[#allocation2] sm:$0xff] }
 0x10a   :  { %192 = vst.msk [vmem:[#allocation2 + $0x8] sm:$0xff] %vm125_vm0, %v171_v55  ;;  %v231_v57 = vadd.f32 %v228_v54, %v207_v56 }
 0x10c   :  { %564 = vtanh.f32 %v231_v57 }
 0x10f   :  { %v173_v58 = vpop.f32.mrf.mxu0 }
 0x110   :  { %v174_v59 = vadd.f32 %v807_v49, %v173_v58 }
 0x111   :  { %v234_v10 = vld [vmem:[#allocation2 + $0x8] sm:$0xff] }
 0x112   :  { %v565_v60 = vpop.eup %564  ;;  %193 = vst.msk [vmem:[#allocation2 + $0x10] sm:$0xff] %vm125_vm0, %v174_v59 }
 0x113   :  { %233 = vst.msk [vmem:[#allocation3] sm:$0xff] %vm125_vm0, %v565_v60  ;;  %538 = vmatmul.msk.f32.vlgmr.msra.gmra.mxu2 %vm125_vm0, %v565_v60 }
 0x114   :  { %354 = vmatpush.msra.mxu2 %v697_v7 }
 0x116   :  { %355 = vmatpush.msra.mxu2 %v700_v8 }
 0x117   :  { %v176_v61 = vpop.f32.mrf.mxu0 }
 0x118   :  { %v177_v62 = vadd.f32 %v807_v49, %v176_v61  ;;  %356 = vmatpush.msra.mxu2 %v732_v18 }
 0x119   :  { %v261_v26 = vld [vmem:[#allocation2 + $0x10] sm:$0xff] }
 0x11a   :  { %194 = vst.msk [vmem:[#allocation2 + $0x18] sm:$0xff] %vm125_vm0, %v177_v62  ;;  %v423_v63 = vld [vmem:[#allocation3] sm:$0xff]  ;;  %357 = vmatpush.msra.mxu2 %v735_v19 }
 0x11b   :  { %545 = vmatmul.msk.f32.vlgmr.msra.gmra.mxu3 %vm125_vm0, %v423_v63 }
 0x11c   :  { %358 = vmatpush.msra.mxu2 %v737_v20 }
 0x11e   :  { %359 = vmatpush.msra.mxu2 %v741_v21 }
 0x11f   :  { %v179_v0 = vpop.f32.mrf.mxu0 }
 0x120   :  { %v180_v1 = vadd.f32 %v807_v49, %v179_v0  ;;  %360 = vmatpush.msra.mxu2 %v747_v22 }
 0x121   :  { %v288_v33 = vld [vmem:[#allocation2 + $0x18] sm:$0xff] }
 0x122   :  { %195 = vst.msk [vmem:[#allocation2 + $0x20] sm:$0xff] %vm125_vm0, %v180_v1  ;;  %361 = vmatpush.msra.mxu2 %v751_v23 }
 0x127   :  { %v182_v2 = vpop.f32.mrf.mxu0 }
 0x128   :  { %v183_v3 = vadd.f32 %v807_v49, %v182_v2 }
 0x12a   :  { %196 = vst.msk [vmem:[#allocation2 + $0x28] sm:$0xff] %vm125_vm0, %v183_v3 }
 0x12f   :  { %v185_v4 = vpop.f32.mrf.mxu0 }
 0x130   :  { %v186_v5 = vadd.f32 %v807_v49, %v185_v4 }
 0x132   :  { %197 = vst.msk [vmem:[#allocation2 + $0x30] sm:$0xff] %vm125_vm0, %v186_v5 }
 0x137   :  { %v188_v24 = vpop.f32.mrf.mxu0 }
 0x138   :  { %v189_v25 = vadd.f32 %v807_v49, %v188_v24 }
 0x139   :  { %v369_v46 = vld [vmem:[#allocation2 + $0x30] sm:$0xff] }
 0x13a   :  { %198 = vst.msk [vmem:[#allocation2 + $0x38] sm:$0xff] %vm125_vm0, %v189_v25 }
 0x141   :  { %v396_v53 = vld [vmem:[#allocation2 + $0x38] sm:$0xff] }
 0x196   :  { %v255_v11 = vpop.f32.mrf.mxu2 }
 0x197   :  { %v258_v12 = vadd.f32 %v255_v11, %v234_v10 }
 0x199   :  { %566 = vtanh.f32 %v258_v12 }
 0x19e   :  { %v484_v14 = vpop.f32.mrf.mxu3 }
 0x19f   :  { %v567_v15 = vpop.eup %566  ;;  %v485_v16 = vadd.f32 %v843_v13, %v484_v14 }
 0x1a0   :  { %260 = vst.msk [vmem:[#allocation3 + $0x8] sm:$0xff] %vm125_vm0, %v567_v15  ;;  %539 = vmatmul.msk.f32.vlgmr.msrb.gmra.mxu1 %vm125_vm0, %v567_v15 }
 0x1a1   :  { %508 = vst [vmem:[%s921_s6] sm:$0xff] %v485_v16  ;;  %381 = vmatpush.msrb.mxu1 %v697_v7 }
 0x1a3   :  { %382 = vmatpush.msrb.mxu1 %v700_v8 }
 0x1a5   :  { %383 = vmatpush.msrb.mxu1 %v732_v18 }
 0x1a7   :  { %v424_v17 = vld [vmem:[#allocation3 + $0x8] sm:$0xff]  ;;  %384 = vmatpush.msrb.mxu1 %v735_v19 }
 0x1a8   :  { %546 = vmatmul.msk.f32.gmra.mxu3 %vm125_vm0, %v424_v17 }
 0x1a9   :  { %385 = vmatpush.msrb.mxu1 %v737_v20 }
 0x1ab   :  { %386 = vmatpush.msrb.mxu1 %v741_v21 }
 0x1ad   :  { %387 = vmatpush.msrb.mxu1 %v747_v22 }
 0x1af   :  { %388 = vmatpush.msrb.mxu1 %v751_v23 }
 0x21d   :  { %v282_v27 = vpop.f32.mrf.mxu1 }
 0x21e   :  { %v285_v28 = vadd.f32 %v282_v27, %v261_v26 }
 0x220   :  { %568 = vtanh.f32 %v285_v28 }
 0x226   :  { %v569_v29 = vpop.eup %568 }
 0x227   :  { %287 = vst.msk [vmem:[#allocation3 + $0x10] sm:$0xff] %vm125_vm0, %v569_v29  ;;  %540 = vmatmul.msk.f32.vlgmr.msra.gmra.mxu1 %vm125_vm0, %v569_v29 }
 0x22b   :  { %v487_v30 = vpop.f32.mrf.mxu3 }
 0x22c   :  { %v488_v31 = vadd.f32 %v843_v13, %v487_v30 }
 0x22e   :  { %509 = vst [vmem:[%s921_s6 + $0x8] sm:$0xff] %v488_v31  ;;  %v425_v32 = vld [vmem:[#allocation3 + $0x10] sm:$0xff] }
 0x22f   :  { %547 = vmatmul.msk.f32.gmra.mxu3 %vm125_vm0, %v425_v32 }
 0x2a4   :  { %v309_v34 = vpop.f32.mrf.mxu1 }
 0x2a5   :  { %v312_v35 = vadd.f32 %v309_v34, %v288_v33 }
 0x2a7   :  { %570 = vtanh.f32 %v312_v35 }
 0x2ad   :  { %v571_v36 = vpop.eup %570 }
 0x2ae   :  { %314 = vst.msk [vmem:[#allocation3 + $0x18] sm:$0xff] %vm125_vm0, %v571_v36  ;;  %541 = vmatmul.msk.f32.vlgmr.msrb.gmra.mxu2 %vm125_vm0, %v571_v36 }
 0x2af   :  { %408 = vmatpush.msrb.mxu2 %v697_v7  ;;  %v315_v7 = vld [vmem:[#allocation2 + $0x20] sm:$0xff] }
 0x2b1   :  { %409 = vmatpush.msrb.mxu2 %v700_v8 }
 0x2b2   :  { %v490_v37 = vpop.f32.mrf.mxu3 }
 0x2b3   :  { %v491_v38 = vadd.f32 %v843_v13, %v490_v37  ;;  %410 = vmatpush.msrb.mxu2 %v732_v18 }
 0x2b5   :  { %510 = vst [vmem:[%s921_s6 + $0x10] sm:$0xff] %v491_v38  ;;  %v426_v39 = vld [vmem:[#allocation3 + $0x18] sm:$0xff]  ;;  %411 = vmatpush.msrb.mxu2 %v735_v19 }
 0x2b6   :  { %548 = vmatmul.msk.f32.gmra.mxu3 %vm125_vm0, %v426_v39 }
 0x2b7   :  { %412 = vmatpush.msrb.mxu2 %v737_v20  ;;  %v342_v20 = vld [vmem:[#allocation2 + $0x28] sm:$0xff] }
 0x2b9   :  { %413 = vmatpush.msrb.mxu2 %v741_v21 }
 0x2bb   :  { %414 = vmatpush.msrb.mxu2 %v747_v22 }
 0x2bd   :  { %415 = vmatpush.msrb.mxu2 %v751_v23 }
 0x331   :  { %v336_v8 = vpop.f32.mrf.mxu2 }
 0x332   :  { %v339_v18 = vadd.f32 %v336_v8, %v315_v7 }
 0x334   :  { %572 = vtanh.f32 %v339_v18 }
 0x339   :  { %v493_v40 = vpop.f32.mrf.mxu3 }
 0x33a   :  { %v573_v41 = vpop.eup %572  ;;  %v494_v42 = vadd.f32 %v843_v13, %v493_v40 }
 0x33b   :  { %341 = vst.msk [vmem:[#allocation3 + $0x20] sm:$0xff] %vm125_vm0, %v573_v41  ;;  %542 = vmatmul.msk.f32.vlgmr.msra.gmra.mxu2 %vm125_vm0, %v573_v41 }
 0x33c   :  { %511 = vst [vmem:[%s921_s6 + $0x18] sm:$0xff] %v494_v42 }
 0x342   :  { %v427_v19 = vld [vmem:[#allocation3 + $0x20] sm:$0xff] }
 0x343   :  { %549 = vmatmul.msk.f32.gmra.mxu3 %vm125_vm0, %v427_v19 }
 0x3be   :  { %v363_v21 = vpop.f32.mrf.mxu2 }
 0x3bf   :  { %v366_v22 = vadd.f32 %v363_v21, %v342_v20 }
 0x3c1   :  { %574 = vtanh.f32 %v366_v22 }
 0x3c6   :  { %v496_v23 = vpop.f32.mrf.mxu3 }
 0x3c7   :  { %v575_v43 = vpop.eup %574  ;;  %v497_v44 = vadd.f32 %v843_v13, %v496_v23 }
 0x3c8   :  { %368 = vst.msk [vmem:[#allocation3 + $0x28] sm:$0xff] %vm125_vm0, %v575_v43  ;;  %543 = vmatmul.msk.f32.vlgmr.msrb.gmra.mxu1 %vm125_vm0, %v575_v43 }
 0x3c9   :  { %512 = vst [vmem:[%s921_s6 + $0x20] sm:$0xff] %v497_v44 }
 0x3cf   :  { %v428_v45 = vld [vmem:[#allocation3 + $0x28] sm:$0xff] }
 0x3d0   :  { %550 = vmatmul.msk.f32.gmra.mxu3 %vm125_vm0, %v428_v45 }
 0x445   :  { %v390_v47 = vpop.f32.mrf.mxu1 }
 0x446   :  { %v393_v48 = vadd.f32 %v390_v47, %v369_v46 }
 0x448   :  { %576 = vtanh.f32 %v393_v48 }
 0x44e   :  { %v577_v49 = vpop.eup %576 }
 0x44f   :  { %395 = vst.msk [vmem:[#allocation3 + $0x30] sm:$0xff] %vm125_vm0, %v577_v49  ;;  %544 = vmatmul.msk.f32.vlgmr.msrb.gmra.mxu2 %vm125_vm0, %v577_v49 }
 0x453   :  { %v499_v50 = vpop.f32.mrf.mxu3 }
 0x454   :  { %v500_v51 = vadd.f32 %v843_v13, %v499_v50 }
 0x456   :  { %513 = vst [vmem:[%s921_s6 + $0x28] sm:$0xff] %v500_v51  ;;  %v429_v52 = vld [vmem:[#allocation3 + $0x30] sm:$0xff] }
 0x457   :  { %551 = vmatmul.msk.f32.gmra.mxu3 %vm125_vm0, %v429_v52 }
 0x4d2   :  { %v417_v54 = vpop.f32.mrf.mxu2 }
 0x4d3   :  { %v420_v55 = vadd.f32 %v417_v54, %v396_v53 }
 0x4d5   :  { %578 = vtanh.f32 %v420_v55 }
 0x4da   :  { %v502_v56 = vpop.f32.mrf.mxu3 }
 0x4db   :  { %v579_v57 = vpop.eup %578  ;;  %v503_v58 = vadd.f32 %v843_v13, %v502_v56 }
 0x4dc   :  { %422 = vst.msk [vmem:[#allocation3 + $0x38] sm:$0xff] %vm125_vm0, %v579_v57 }
 0x4dd   :  { %514 = vst [vmem:[%s921_s6 + $0x30] sm:$0xff] %v503_v58 }
 0x4e3   :  { %v430_v59 = vld [vmem:[#allocation3 + $0x38] sm:$0xff] }
 0x4e4   :  { %552 = vmatmul.msk.f32.gmra.mxu3 %vm125_vm0, %v430_v59 }
 0x567   :  { %v505_v60 = vpop.f32.mrf.mxu3 }
 0x568   :  { %v506_v61 = vadd.f32 %v843_v13, %v505_v60 }
 0x56a   :  { %515 = vst [vmem:[%s921_s6 + $0x38] sm:$0xff] %v506_v61 }
 0x56b   :  { %520 = vsyncpa [#allocation5], 1 }
 0x56c   :  { %521 = vsyncpa [#allocation7], 1 }

</bundles_post_ra>
